<compile_context>
chip_gen: v7x
topology: tpu7x:2x2x1
jax: 0.10.0
libtpu: 0.0.40
codegen_flags: <defaults>
</compile_context>

<pallas_src>
import jax
import jax.numpy as jnp
from jax.experimental import pallas as pl
from jax.experimental.pallas import tpu as pltpu


def _choose_tile(total, unit, max_tile):
    """Largest tile <= max_tile that is a multiple of `unit` and divides
    `total`; falls back to the full extent (always a legal block size)."""
    if total % unit != 0:
        return total
    t = min(max_tile, total)
    t -= t % unit
    while total % t != 0:
        t -= unit
    return t


def _ioubce_kernel(x_ref, t_ref, iou_ref, bce_ref,
                   acc_bce, acc_inter, acc_union):
    hw = pl.program_id(1)
    n_hw = pl.num_programs(1)

    x = x_ref[...].astype(jnp.float32)  # (TILE_R, TILE_HW) logits
    t = t_ref[...].astype(jnp.float32)  # (TILE_R, TILE_HW) targets in [0, 1]

    # Single exp(-|x|) feeds both the BCE log-term and the sigmoid.
    e = jnp.exp(-jnp.abs(x))
    # Numerically stable BCE-with-logits: max(x,0) - x*t + log(1 + exp(-|x|)).
    bce_elem = jnp.maximum(x, 0.0) - x * t + jnp.log1p(e)
    # sigmoid(x) = 1/(1+e) for x>=0, e/(1+e) for x<0   (e = exp(-|x|)).
    inv = pl.reciprocal(1.0 + e, approx=True)
    pred = jnp.where(x >= 0.0, inv, e * inv)

    # Per-row lane reduces only (no full 2D reduce / scalar broadcast).
    bce_part = jnp.sum(bce_elem, axis=-1, keepdims=True)    # (TILE_R, 1)
    inter_part = jnp.sum(pred * t, axis=-1, keepdims=True)  # (TILE_R, 1)
    union_part = jnp.sum(pred + t, axis=-1, keepdims=True)  # (TILE_R, 1)

    @pl.when(hw == 0)
    def _():
        acc_bce[...] = jnp.zeros_like(acc_bce)
        acc_inter[...] = jnp.zeros_like(acc_inter)
        acc_union[...] = jnp.zeros_like(acc_union)

    acc_bce[...] += bce_part
    acc_inter[...] += inter_part
    acc_union[...] += union_part

    # Outputs are written exactly once per row tile (no per-step masked HBM
    # stores into a lane-width-1 output).
    @pl.when(hw == n_hw - 1)
    def _():
        inter = acc_inter[...]
        union = acc_union[...]
        iou_ref[...] = (inter + 1.0) / (union - inter + 1.0)
        bce_ref[...] = acc_bce[...]


def ioubce_loss(input_scale, target_scale, *, max_tile_hw=4096, max_tile_r=64):
    """Pallas equivalent of IOUBCE_loss.forward.

    Args:
      input_scale:  (B, C, H, W) logits (f32 or bf16).
      target_scale: (B, C, H, W) targets in [0, 1].
    Returns:
      (C,) float32 vector — sum over batch of (1 - IoU + BCE-mean), divided by B.
    """
    B, C, H, W = input_scale.shape
    HW = H * W
    R = B * C
    x = input_scale.reshape(R, HW)
    t = target_scale.reshape(R, HW)

    tile_hw = _choose_tile(HW, 128, max_tile_hw)  # lane axis, mult of 128
    tile_r = _choose_tile(R, 8, max_tile_r)       # sublane axis, mult of 8
    grid = (R // tile_r, HW // tile_hw)

    iou, bce_sum = pl.pallas_call(
        _ioubce_kernel,
        out_shape=(
            jax.ShapeDtypeStruct((R, 1), jnp.float32),  # per-row IoU
            jax.ShapeDtypeStruct((R, 1), jnp.float32),  # per-row BCE sum
        ),
        grid_spec=pltpu.PrefetchScalarGridSpec(
            num_scalar_prefetch=0,
            grid=grid,
            in_specs=[
                pl.BlockSpec((tile_r, tile_hw), lambda r, h: (r, h)),
                pl.BlockSpec((tile_r, tile_hw), lambda r, h: (r, h)),
            ],
            out_specs=[
                pl.BlockSpec((tile_r, 1), lambda r, h: (r, 0)),
                pl.BlockSpec((tile_r, 1), lambda r, h: (r, 0)),
            ],
            scratch_shapes=[
                pltpu.VMEM((tile_r, 1), jnp.float32),  # acc_bce
                pltpu.VMEM((tile_r, 1), jnp.float32),  # acc_inter
                pltpu.VMEM((tile_r, 1), jnp.float32),  # acc_union
            ],
        ),
        compiler_params=pltpu.CompilerParams(
            # Row tiles are independent -> parallel (megacore on v7x);
            # spatial axis is the reduction -> arbitrary, kept last.
            dimension_semantics=("parallel", "arbitrary"),
        ),
    )(x, t)

    # Tiny (B, C) combine in the wrapper (decouples BCE mean from channels).
    iou = iou.reshape(B, C)
    bce_b = jnp.sum(bce_sum.reshape(B, C), axis=1) / (C * HW)  # per-batch mean
    loss = jnp.sum(1.0 - iou + bce_b[:, None], axis=0) / B      # (C,)
    return loss


def _reference(input_scale, target_scale):
    """Pure-JAX reference mirroring the PyTorch module."""
    B = input_scale.shape[0]
    x = input_scale.astype(jnp.float32)
    t = target_scale.astype(jnp.float32)
    bce_elem = jnp.maximum(x, 0.0) - x * t + jnp.log1p(jnp.exp(-jnp.abs(x)))
    bce = jnp.mean(bce_elem, axis=(1, 2, 3))                      # (B,)
    pred = jax.nn.sigmoid(x)
    inter = jnp.sum(pred * t, axis=(2, 3))                        # (B, C)
    union = jnp.sum(pred + t, axis=(2, 3))                        # (B, C)
    iou = (inter + 1.0) / (union - inter + 1.0)                   # (B, C)
    loss = 1.0 - iou + bce[:, None]                               # (B, C)
    return jnp.sum(loss, axis=0) / B                              # (C,)


if __name__ == "__main__":
    key = jax.random.PRNGKey(0)
    k1, k2 = jax.random.split(key)
    B, C, H, W = 2, 4, 16, 16

    logits = jax.random.normal(k1, (B, C, H, W), dtype=jnp.float32)
    targets = (jax.random.uniform(k2, (B, C, H, W)) > 0.5).astype(jnp.float32)

    out = ioubce_loss(logits, targets)
    jax.block_until_ready(out)

    ref = _reference(logits, targets)
    assert out.shape == (C,)
    # Tolerance accounts for the EUP approximate-reciprocal sigmoid path.
    assert jnp.allclose(out, ref, atol=2e-3, rtol=2e-3), (out, ref)

    print("KERNEL_OK")
</pallas_src>

<mosaic_0001>
module attributes {stable_mosaic.version = 11 : i64} {
  func.func @_ioubce_kernel(%arg0: i32, %arg1: i32, %arg2: memref<8x256xf32, #tpu.memory_space<vmem>>, %arg3: memref<8x256xf32, #tpu.memory_space<vmem>>, %arg4: memref<8x1xf32, #tpu.memory_space<vmem>>, %arg5: memref<8x1xf32, #tpu.memory_space<vmem>>, %arg6: memref<8x1xf32, #tpu.memory_space<vmem>>, %arg7: memref<8x1xf32, #tpu.memory_space<vmem>>, %arg8: memref<8x1xf32, #tpu.memory_space<vmem>>) attributes {dimension_semantics = [#tpu.dimension_semantics<parallel>, #tpu.dimension_semantics<arbitrary>], iteration_bounds = array<i64: 1, 1>, scalar_prefetch = 0 : i64, scratch_operands = 3 : i64, tpu.core_type = #tpu.core_type<tc>, window_params = [{transform_indices = @transform_0, window_bounds = array<i64: 8, 256>}, {transform_indices = @transform_1, window_bounds = array<i64: 8, 256>}, {transform_indices = @transform_2, window_bounds = array<i64: 8, 1>}, {transform_indices = @transform_3, window_bounds = array<i64: 8, 1>}]} {
    %c0 = arith.constant 0 : index
    %c0_0 = arith.constant 0 : index
    %0 = vector.load %arg2[%c0, %c0_0] : memref<8x256xf32, #tpu.memory_space<vmem>>, vector<8x256xf32>
    %c0_1 = arith.constant 0 : index
    %c0_2 = arith.constant 0 : index
    %1 = vector.load %arg3[%c0_1, %c0_2] : memref<8x256xf32, #tpu.memory_space<vmem>>, vector<8x256xf32>
    %2 = math.absf %0 : vector<8x256xf32>
    %cst = arith.constant 0.000000e+00 : f32
    %3 = vector.broadcast %cst : f32 to vector<8x256xf32>
    %4 = arith.subf %3, %2 : vector<8x256xf32>
    %5 = math.exp %4 : vector<8x256xf32>
    %cst_3 = arith.constant 0.000000e+00 : f32
    %6 = vector.broadcast %cst_3 : f32 to vector<8x256xf32>
    %7 = arith.maximumf %0, %6 : vector<8x256xf32>
    %8 = arith.mulf %0, %1 : vector<8x256xf32>
    %9 = arith.subf %7, %8 : vector<8x256xf32>
    %10 = math.log1p %5 : vector<8x256xf32>
    %11 = arith.addf %9, %10 : vector<8x256xf32>
    %cst_4 = arith.constant 1.000000e+00 : f32
    %12 = vector.broadcast %cst_4 : f32 to vector<8x256xf32>
    %13 = arith.addf %12, %5 : vector<8x256xf32>
    %14 = tpu.reciprocal %13 {approx = true} : vector<8x256xf32> -> vector<8x256xf32>
    %cst_5 = arith.constant 0.000000e+00 : f32
    %15 = vector.broadcast %cst_5 : f32 to vector<8x256xf32>
    %16 = arith.cmpf oge, %0, %15 : vector<8x256xf32>
    %17 = arith.mulf %5, %14 : vector<8x256xf32>
    %18 = arith.select %16, %14, %17 : vector<8x256xi1>, vector<8x256xf32>
    %cst_6 = arith.constant dense<0.000000e+00> : vector<8xf32>
    %19 = vector.multi_reduction <add>, %11, %cst_6 [1] : vector<8x256xf32> to vector<8xf32>
    %20 = vector.shape_cast %19 : vector<8xf32> to vector<8x1xf32>
    %21 = arith.mulf %18, %1 : vector<8x256xf32>
    %cst_7 = arith.constant dense<0.000000e+00> : vector<8xf32>
    %22 = vector.multi_reduction <add>, %21, %cst_7 [1] : vector<8x256xf32> to vector<8xf32>
    %23 = vector.shape_cast %22 : vector<8xf32> to vector<8x1xf32>
    %24 = arith.addf %18, %1 : vector<8x256xf32>
    %cst_8 = arith.constant dense<0.000000e+00> : vector<8xf32>
    %25 = vector.multi_reduction <add>, %24, %cst_8 [1] : vector<8x256xf32> to vector<8xf32>
    %26 = vector.shape_cast %25 : vector<8xf32> to vector<8x1xf32>
    %c0_i32 = arith.constant 0 : i32
    %27 = arith.cmpi eq, %arg1, %c0_i32 : i32
    %28 = arith.extui %27 : i1 to i32
    %c0_i32_9 = arith.constant 0 : i32
    %29 = arith.cmpi ne, %28, %c0_i32_9 : i32
    scf.if %29 {
      %cst_24 = arith.constant 0.000000e+00 : f32
      %42 = vector.broadcast %cst_24 : f32 to vector<8x1xf32>
      %c0_25 = arith.constant 0 : index
      %c0_26 = arith.constant 0 : index
      %43 = vector.load %arg6[%c0_25, %c0_26] : memref<8x1xf32, #tpu.memory_space<vmem>>, vector<8x1xf32>
      tpu.vector_store %arg6[%c0_25, %c0_26], %42 {strides = array<i32>} : memref<8x1xf32, #tpu.memory_space<vmem>>, vector<8x1xf32>,
      %cst_27 = arith.constant 0.000000e+00 : f32
      %44 = vector.broadcast %cst_27 : f32 to vector<8x1xf32>
      %c0_28 = arith.constant 0 : index
      %c0_29 = arith.constant 0 : index
      %45 = vector.load %arg7[%c0_28, %c0_29] : memref<8x1xf32, #tpu.memory_space<vmem>>, vector<8x1xf32>
      tpu.vector_store %arg7[%c0_28, %c0_29], %44 {strides = array<i32>} : memref<8x1xf32, #tpu.memory_space<vmem>>, vector<8x1xf32>,
      %cst_30 = arith.constant 0.000000e+00 : f32
      %46 = vector.broadcast %cst_30 : f32 to vector<8x1xf32>
      %c0_31 = arith.constant 0 : index
      %c0_32 = arith.constant 0 : index
      %47 = vector.load %arg8[%c0_31, %c0_32] : memref<8x1xf32, #tpu.memory_space<vmem>>, vector<8x1xf32>
      tpu.vector_store %arg8[%c0_31, %c0_32], %46 {strides = array<i32>} : memref<8x1xf32, #tpu.memory_space<vmem>>, vector<8x1xf32>,
    } else {
    }
    %c0_10 = arith.constant 0 : index
    %c0_11 = arith.constant 0 : index
    %30 = vector.load %arg6[%c0_10, %c0_11] : memref<8x1xf32, #tpu.memory_space<vmem>>, vector<8x1xf32>
    %31 = arith.addf %30, %20 : vector<8x1xf32>
    %c0_12 = arith.constant 0 : index
    %c0_13 = arith.constant 0 : index
    %32 = vector.load %arg6[%c0_12, %c0_13] : memref<8x1xf32, #tpu.memory_space<vmem>>, vector<8x1xf32>
    tpu.vector_store %arg6[%c0_12, %c0_13], %31 {strides = array<i32>} : memref<8x1xf32, #tpu.memory_space<vmem>>, vector<8x1xf32>,
    %c0_14 = arith.constant 0 : index
    %c0_15 = arith.constant 0 : index
    %33 = vector.load %arg7[%c0_14, %c0_15] : memref<8x1xf32, #tpu.memory_space<vmem>>, vector<8x1xf32>
    %34 = arith.addf %33, %23 : vector<8x1xf32>
    %c0_16 = arith.constant 0 : index
    %c0_17 = arith.constant 0 : index
    %35 = vector.load %arg7[%c0_16, %c0_17] : memref<8x1xf32, #tpu.memory_space<vmem>>, vector<8x1xf32>
    tpu.vector_store %arg7[%c0_16, %c0_17], %34 {strides = array<i32>} : memref<8x1xf32, #tpu.memory_space<vmem>>, vector<8x1xf32>,
    %c0_18 = arith.constant 0 : index
    %c0_19 = arith.constant 0 : index
    %36 = vector.load %arg8[%c0_18, %c0_19] : memref<8x1xf32, #tpu.memory_space<vmem>>, vector<8x1xf32>
    %37 = arith.addf %36, %26 : vector<8x1xf32>
    %c0_20 = arith.constant 0 : index
    %c0_21 = arith.constant 0 : index
    %38 = vector.load %arg8[%c0_20, %c0_21] : memref<8x1xf32, #tpu.memory_space<vmem>>, vector<8x1xf32>
    tpu.vector_store %arg8[%c0_20, %c0_21], %37 {strides = array<i32>} : memref<8x1xf32, #tpu.memory_space<vmem>>, vector<8x1xf32>,
    %c0_i32_22 = arith.constant 0 : i32
    %39 = arith.cmpi eq, %arg1, %c0_i32_22 : i32
    %40 = arith.extui %39 : i1 to i32
    %c0_i32_23 = arith.constant 0 : i32
    %41 = arith.cmpi ne, %40, %c0_i32_23 : i32
    scf.if %41 {
      %c0_24 = arith.constant 0 : index
      %c0_25 = arith.constant 0 : index
      %42 = vector.load %arg7[%c0_24, %c0_25] : memref<8x1xf32, #tpu.memory_space<vmem>>, vector<8x1xf32>
      %c0_26 = arith.constant 0 : index
      %c0_27 = arith.constant 0 : index
      %43 = vector.load %arg8[%c0_26, %c0_27] : memref<8x1xf32, #tpu.memory_space<vmem>>, vector<8x1xf32>
      %cst_28 = arith.constant 1.000000e+00 : f32
      %44 = vector.broadcast %cst_28 : f32 to vector<8x1xf32>
      %45 = arith.addf %42, %44 : vector<8x1xf32>
      %46 = arith.subf %43, %42 : vector<8x1xf32>
      %cst_29 = arith.constant 1.000000e+00 : f32
      %47 = vector.broadcast %cst_29 : f32 to vector<8x1xf32>
      %48 = arith.addf %46, %47 : vector<8x1xf32>
      %49 = arith.divf %45, %48 : vector<8x1xf32>
      %c0_30 = arith.constant 0 : index
      %c0_31 = arith.constant 0 : index
      %50 = vector.load %arg4[%c0_30, %c0_31] : memref<8x1xf32, #tpu.memory_space<vmem>>, vector<8x1xf32>
      tpu.vector_store %arg4[%c0_30, %c0_31], %49 {strides = array<i32>} : memref<8x1xf32, #tpu.memory_space<vmem>>, vector<8x1xf32>,
      %c0_32 = arith.constant 0 : index
      %c0_33 = arith.constant 0 : index
      %51 = vector.load %arg6[%c0_32, %c0_33] : memref<8x1xf32, #tpu.memory_space<vmem>>, vector<8x1xf32>
      %c0_34 = arith.constant 0 : index
      %c0_35 = arith.constant 0 : index
      %52 = vector.load %arg5[%c0_34, %c0_35] : memref<8x1xf32, #tpu.memory_space<vmem>>, vector<8x1xf32>
      tpu.vector_store %arg5[%c0_34, %c0_35], %51 {strides = array<i32>} : memref<8x1xf32, #tpu.memory_space<vmem>>, vector<8x1xf32>,
    } else {
    }
    return
  }
  func.func @transform_0(%arg0: i32, %arg1: i32) -> (i32, i32) {
    %c0_i32 = arith.constant 0 : i32
    return %arg0, %arg1 : i32, i32
  }
  func.func @transform_1(%arg0: i32, %arg1: i32) -> (i32, i32) {
    %c0_i32 = arith.constant 0 : i32
    return %arg0, %arg1 : i32, i32
  }
  func.func @transform_2(%arg0: i32, %arg1: i32) -> (i32, i32) {
    %c0_i32 = arith.constant 0 : i32
    %c0_i32_0 = arith.constant 0 : i32
    return %arg0, %c0_i32 : i32, i32
  }
  func.func @transform_3(%arg0: i32, %arg1: i32) -> (i32, i32) {
    %c0_i32 = arith.constant 0 : i32
    %c0_i32_0 = arith.constant 0 : i32
    return %arg0, %c0_i32 : i32, i32
  }
}

</mosaic_0001>

<bundles_post_ra>
// kernel: tpu_custom_call.1
= control target key start
LH: loop header
LB: loop body
LE: loop exit
PB: predicated region body
PF: predicated region fallthrough
CT: control target
= control target key end

     0   :  { %9 = vsyncpa [#allocation6], 0  ;;  %s265_s0 = inlined_call_operand.hbm [shape: f32[8,256], index: 0, kind: input, shape index: {}]   ;;  %s266_s1 = inlined_call_operand.hbm [shape: f32[8,256], index: 1, kind: input, shape index: {}]   ;;  %s267_s2 = inlined_call_operand.vmem [shape: f32[8,1], index: 2, kind: output, shape index: {0}]   ;;  %s268_s3 = inlined_call_operand.vmem [shape: f32[8,1], index: 3, kind: output, shape index: {1}]  }
   0x1   :  { %10 = vsyncpa [#allocation8], 0  ;;  %s204_s12 = smov [#allocation5]   ;;  %s205_s14 = smov [#allocation7]  }
   0x2   :  { %s17_s13 = sshll.u32 %s204_s12, 4  ;;  %s27_s15 = sshll.u32 %s205_s14, 4  ;;  %s18_s13 = int_to_ptr.vmem [resolvable:$true] %s17_s13  ;;  %s28_s15 = int_to_ptr.vmem [resolvable:$true] %s27_s15 }
   0x3   :  { %s156_s18 = scalar_lea.hbm %s265_s0, 256 }
   0x4   :  { %p157_p0 = scmp.ne.s32.totalorder %s265_s0, %s156_s18  ;;  %p160_p1 = scmp.lt.u32.totalorder %s156_s18, %s265_s0 }
   0x6   :  { %p162_p2 = pnand %p160_p1, %p157_p0 }
   0x8   :  { %165 = shalt.err (!%p162_p2)
}
   0x9   :  { %s166_s23 = scalar_lea.vmem %s18_s13, 256  ;;  %p171_p4 = scmp.lt.s32.totalorder %s18_s13, %s18_s13 }
   0xa   :  { %p167_p3 = scmp.ne.s32.totalorder %s18_s13, %s166_s23  ;;  %p172_p5 = scmp.lt.s32.totalorder %s166_s23, %s166_s23 }
   0xc   :  { %p173_p6 = por %p172_p5, %p171_p4 }
   0xe   :  { %p174_p7 = pnand %p173_p6, %p167_p3 }
  0x10   :  { %177 = shalt.err (!%p174_p7)
}
  0x11   :  { %20 = dma.hbm_to_vmem [thread:$0]  %s265_s0, 256, %s18_s13, [#allocation6]  }
  0x12   :  { %s178_s28 = scalar_lea.hbm %s266_s1, 256 }
  0x13   :  { %p179_p8 = scmp.ne.s32.totalorder %s266_s1, %s178_s28  ;;  %p182_p9 = scmp.lt.u32.totalorder %s178_s28, %s266_s1 }
  0x15   :  { %p184_p10 = pnand %p182_p9, %p179_p8 }
  0x17   :  { %187 = shalt.err (!%p184_p10)
}
  0x18   :  { %s188_s6 = scalar_lea.vmem %s28_s15, 256  ;;  %p193_p12 = scmp.lt.s32.totalorder %s28_s15, %s28_s15 }
  0x19   :  { %p189_p11 = scmp.ne.s32.totalorder %s28_s15, %s188_s6  ;;  %p194_p13 = scmp.lt.s32.totalorder %s188_s6, %s188_s6 }
  0x1b   :  { %p195_p0 = por %p194_p13, %p193_p12 }
  0x1d   :  { %p196_p1 = pnand %p195_p0, %p189_p11 }
  0x1f   :  { %199 = shalt.err (!%p196_p1)
}
  0x20   :  { %30 = dma.hbm_to_vmem [thread:$0]  %s266_s1, 256, %s28_s15, [#allocation8]  }
  0x21   :  { %200 = dma.done.wait [#allocation6], 256  }
  0x22   :  { %201 = vsyncadd [#allocation6], 4294967040 }
  0x23   :  { %202 = dma.done.wait [#allocation8], 256  }
  0x24   :  { %203 = vsyncadd [#allocation8], 4294967040  ;;  %vm102_vm0 = vcmask 7168   ;;  %v206_v0 = vmov 0.0   ;;  %v37_v1 = vld [vmem:[#allocation5] sm:$0xff]  ;;  %v38_v2 = vld [vmem:[#allocation5 + $0x8] sm:$0xff] }
  0x25   :  { %104 = vst.msk [vmem:[#allocation3] sm:$0xff] %vm102_vm0, %v206_v0  ;;  %103 = vst.msk [vmem:[#allocation2] sm:$0xff] %vm102_vm0, %v206_v0  ;;  %v41_v3 = vand.u32 2147483647, %v37_v1  ;;  %v42_v4 = vand.u32 2147483647, %v38_v2 }
  0x26   :  { %105 = vst.msk [vmem:[#allocation4] sm:$0xff] %vm102_vm0, %v206_v0  ;;  %v39_v15 = vld [vmem:[#allocation7] sm:$0xff]  ;;  %v40_v17 = vld [vmem:[#allocation7 + $0x8] sm:$0xff]  ;;  %v49_v18 = vmax.f32 %v37_v1, 0.0  ;;  %v50_v22 = vmax.f32 %v38_v2, 0.0  ;;  %vm79_vm1 = vcmp.ge.f32.partialorder %v37_v1, 0.0 }
  0x27   :  { %v43_v5 = vsub.f32 0.0, %v41_v3  ;;  %v44_v6 = vsub.f32 0.0, %v42_v4  ;;  %v51_v19 = vmul.f32 %v39_v15, %v37_v1  ;;  %v52_v23 = vmul.f32 %v40_v17, %v38_v2 }
  0x28   :  { %vm80_vm2 = vcmp.ge.f32.partialorder %v38_v2, 0.0 }
  0x29   :  { %v45_v7 = vmul.f32 1.442695, %v43_v5  ;;  %v47_v8 = vmul.f32 1.442695, %v44_v6  ;;  %v53_v31 = vsub.f32 %v49_v18, %v51_v19  ;;  %v54_v35 = vsub.f32 %v50_v22, %v52_v23 }
  0x2b   :  { %142 = vpow2.f32 %v45_v7 }
  0x2c   :  { %144 = vpow2.f32 %v47_v8  ;;  %v110_v50 = vld [vmem:[#allocation3] sm:$0xff]  ;;  %v106_v52 = vld [vmem:[#allocation2] sm:$0xff] }
  0x2d   :  { %v113_v54 = vld [vmem:[#allocation4] sm:$0xff] }
  0x35   :  { %v143_v9 = vpop.eup %142 }
  0x36   :  { %v145_v10 = vpop.eup %144  ;;  %v55_v11 = vadd.f32 1.0, %v143_v9  ;;  %v58_v13 = vmul.f32 -0.5, %v143_v9  ;;  %v61_v20 = vand.u32 2147483647, %v143_v9 }
  0x37   :  { %v64_v12 = vadd.f32 1.0, %v145_v10  ;;  %v67_v14 = vmul.f32 -0.5, %v145_v10  ;;  %v70_v24 = vand.u32 2147483647, %v145_v10 }
  0x38   :  { %146 = vrcp.f32 %v55_v11  ;;  %v59_v16 = vadd.f32 1.0, %v58_v13  ;;  %vm62_vm3 = vcmp.lt.f32.partialorder %v61_v20, 0.0004427343 }
  0x39   :  { %148 = vrcp.f32 %v64_v12  ;;  %v68_v21 = vadd.f32 1.0, %v67_v14  ;;  %vm71_vm4 = vcmp.lt.f32.partialorder %v70_v24, 0.0004427343 }
  0x3a   :  { %150 = vlog2.f32 %v55_v11  ;;  %v60_v28 = vmul.f32 %v143_v9, %v59_v16 }
  0x3b   :  { %152 = vlog2.f32 %v64_v12  ;;  %v69_v32 = vmul.f32 %v145_v10, %v68_v21 }
  0x42   :  { %v147_v25 = vpop.eup %146 }
  0x43   :  { %v149_v26 = vpop.eup %148  ;;  %v81_v27 = vmul.f32 %v147_v25, %v143_v9 }
  0x44   :  { %v151_v29 = vpop.eup %150  ;;  %v82_v30 = vmul.f32 %v149_v26, %v145_v10 }
  0x45   :  { %v153_v33 = vpop.eup %152  ;;  %v83_v34 = vsel %vm79_vm1, %v147_v25, %v81_v27  ;;  %v57_v36 = vmul.f32 0.6931472, %v151_v29 }
  0x46   :  { %v84_v37 = vsel %vm80_vm2, %v149_v26, %v82_v30  ;;  %v88_v38 = vmul.f32 %v83_v34, %v39_v15  ;;  %v66_v39 = vmul.f32 0.6931472, %v153_v33  ;;  %v93_v41 = vadd.f32 %v83_v34, %v39_v15 }
  0x47   :  { %v89_v40 = vmul.f32 %v84_v37, %v40_v17  ;;  %v94_v42 = vadd.f32 %v84_v37, %v40_v17  ;;  %v63_v43 = vsel %vm62_vm3, %v60_v28, %v57_v36 }
  0x48   :  { %v72_v44 = vsel %vm71_vm4, %v69_v32, %v66_v39  ;;  %v73_v45 = vadd.f32 %v63_v43, %v53_v31 }
  0x49   :  { %v90_v46 = vadd.f32 %v89_v40, %v88_v38  ;;  %v74_v47 = vadd.f32 %v72_v44, %v54_v35  ;;  %v95_v48 = vadd.f32 %v94_v42, %v93_v41 }
  0x4b   :  { %91 = vadd.xlane.f32.xlu0 %v90_v46  ;;  %v85_v49 = vadd.f32 %v74_v47, %v73_v45 }
  0x4d   :  { %86 = vadd.xlane.f32.xlu1 %v85_v49 }
  0x4f   :  { %96 = vadd.xlane.f32.xlu0 %v95_v48 }
  0xd8   :  { %v92_v51 = vpop.xlane.xlu0 %91 }
  0xd9   :  { %v111_v53 = vadd.f32 %v110_v50, %v92_v51 }
  0xda   :  { %v87_v55 = vpop.xlane.xlu1 %86 }
  0xdb   :  { %112 = vst.msk [vmem:[#allocation3] sm:$0xff] %vm102_vm0, %v111_v53  ;;  %v107_v56 = vadd.f32 %v106_v52, %v87_v55 }
  0xdc   :  { %v97_v57 = vpop.xlane.xlu0 %96 }
  0xdd   :  { %v114_v58 = vadd.f32 %v113_v54, %v97_v57  ;;  %109 = vst.msk [vmem:[#allocation2] sm:$0xff] %vm102_vm0, %v107_v56 }
  0xdf   :  { %115 = vst.msk [vmem:[#allocation4] sm:$0xff] %vm102_vm0, %v114_v58 }
  0xe2   :  { %v119_v60 = vld [vmem:[#allocation3] sm:$0xff] }
  0xe3   :  { %v121_v0 = vadd.f32 1.0, %v119_v60 }
  0xe4   :  { %v127_v59 = vld [vmem:[#allocation2] sm:$0xff] }
  0xe5   :  { %128 = vst.msk [vmem:[%s268_s3] sm:$0xff] %vm102_vm0, %v127_v59 }
  0xe6   :  { %v120_v61 = vld [vmem:[#allocation4] sm:$0xff] }
  0xe7   :  { %v122_v62 = vsub.f32 %v120_v61, %v119_v60 }
  0xe9   :  { %v123_v63 = vadd.f32 1.0, %v122_v62 }
  0xeb   :  { %154 = vrcp.f32 %v123_v63 }
  0xf5   :  { %v155_v1 = vpop.eup %154 }
  0xf6   :  { %v125_v2 = vmul.f32 %v155_v1, %v121_v0 }
  0xf8   :  { %126 = vst.msk [vmem:[%s267_s2] sm:$0xff] %vm102_vm0, %v125_v2 }
  0xf9   :  { %137 = vsyncpa [#allocation6], 1 }
  0xfa   :  { %138 = vsyncpa [#allocation8], 1 }

</bundles_post_ra>
